<compile_context>
chip_gen: v7x
topology: tpu7x:2x2x1
jax: 0.10.0
libtpu: 0.0.40
codegen_flags: <defaults>
</compile_context>

<pallas_src>
import jax
import jax.numpy as jnp
from jax import lax
from jax.experimental import pallas as pl
from jax.experimental.pallas import tpu as pltpu

SQRT_HALF = 0.7071067811865476  # 1/sqrt(2)
_MIB = 1024 * 1024

_PIPE_OK = None  # cached result of the pipeline_mode probe


def _gelu(x):
    # exact (erf based) GELU, matching torch.nn.GELU() default
    return 0.5 * x * (1.0 + lax.erf(x * SQRT_HALF))


def _layernorm(x, gamma, beta, eps=1e-5):
    mean = jnp.mean(x, axis=-1, keepdims=True)
    var = jnp.mean((x - mean) ** 2, axis=-1, keepdims=True)
    return (x - mean) * lax.rsqrt(var + eps) * gamma + beta


# ------------------------------------------------------------ hw probing ----
def _vmem_capacity_bytes():
    try:
        cap = int(pltpu.get_tpu_info().vmem_capacity_bytes)
        if cap > 0:
            return cap
    except Exception:
        pass
    return 64 * _MIB  # conservative (v7x per-core)


def _probe_kernel(x_ref, o_ref):
    o_ref[...] = x_ref[...] + 1.0


def _pipeline_mode_supported():
    """Check (once) that pl.Buffered(1) BlockSpecs lower and run correctly."""
    global _PIPE_OK
    if _PIPE_OK is not None:
        return _PIPE_OK
    try:
        x = jnp.arange(16 * 128, dtype=jnp.float32).reshape(16, 128)
        out = pl.pallas_call(
            _probe_kernel,
            grid=(2,),
            in_specs=[pl.BlockSpec((8, 128), lambda i: (i, 0),
                                   pipeline_mode=pl.Buffered(1))],
            out_specs=pl.BlockSpec((8, 128), lambda i: (i, 0)),
            out_shape=jax.ShapeDtypeStruct((16, 128), jnp.float32),
        )(x)
        jax.block_until_ready(out)
        _PIPE_OK = bool(jnp.allclose(out, x + 1.0))
    except Exception:
        _PIPE_OK = False
    return _PIPE_OK


def _pick_seq_tile(n, preferred):
    """Largest divisor of n <= preferred, preferring lane-dense 128-multiples."""
    if n <= preferred:
        return n
    t = preferred - preferred % 128
    while t >= 128:
        if n % t == 0:
            return t
        t -= 128
    for t in range(min(preferred, n), 7, -8):
        if n % t == 0:
            return t
    return n


def _vmem_limit(estimate_bytes, capacity):
    hi = int(0.85 * capacity)                       # headroom for Mosaic scratch
    want = int(1.5 * estimate_bytes) + 4 * _MIB     # margin over the flat estimate
    return int(min(max(want, 32 * _MIB), hi))


def _const_spec(arr, single_buffer):
    nd = arr.ndim
    idx = lambda *_args: (0,) * nd
    if single_buffer:
        # Grid-invariant block: one VMEM buffer instead of two.
        return pl.BlockSpec(arr.shape, idx, pipeline_mode=pl.Buffered(1))
    return pl.BlockSpec(arr.shape, idx)


# ------------------------------------------------------------------ stage A --
def _make_qkv_kernel(C):
    def kernel(x_ref, w_fc, b_fc, g1, be1, w_qkv, q_ref, k_ref, v_ref):
        x = x_ref[0].astype(jnp.bfloat16)                            # (TS, C)
        h = jnp.dot(x, w_fc[...], preferred_element_type=jnp.float32) + b_fc[...]
        xn = _layernorm(_gelu(h), g1[...], be1[...]).astype(jnp.bfloat16)
        # one fused (TS,C)@(C,3C) matmul; attention scale already folded into
        # the q columns of w_qkv in the wrapper.
        qkv = jnp.dot(xn, w_qkv[...], preferred_element_type=jnp.float32)
        q_ref[0] = qkv[:, :C].astype(q_ref.dtype)
        k_ref[0] = qkv[:, C:2 * C].astype(k_ref.dtype)
        v_ref[0] = qkv[:, 2 * C:].astype(v_ref.dtype)
    return kernel


# ------------------------------------------------------------------ stage B --
def _make_attn_kernel(num_heads, head_dim, C, attn_dtype, return_attn):
    C2 = C // 2
    attn_is_bf16 = jnp.dtype(attn_dtype) == jnp.dtype(jnp.bfloat16)

    def kernel(*refs):
        (x_ref, q_ref, k_ref, v_ref,
         w_mu, b_mu, w_ls, b_ls, g2, be2, g3, be3,
         w_m1, b_m1, w_m2, b_m2, w_l1, b_l1, w_l2, b_l2) = refs[:20]
        if return_attn:
            mu_ref, ls_ref, attn_ref, slab_ref = refs[20:]
        else:
            mu_ref, ls_ref, slab_ref = refs[20:]
            attn_ref = None

        x = x_ref[0]                                 # (TQ, C) f32 (residual)

        # Static per-head loop; each head's output is sunk into the bf16 slab
        # scratch so only one head's (TQ, N) softmax temporaries stay live.
        # TODO(synk): chunk K/V along N with an online softmax for very large N.
        for hh in range(num_heads):
            lo = hh * head_dim
            hi = lo + head_dim
            q = q_ref[0, :, lo:hi]                   # (TQ, hd) bf16, pre-scaled
            k = k_ref[0, :, lo:hi]                   # (N,  hd) bf16
            v = v_ref[0, :, lo:hi]                   # (N,  hd) bf16

            # contract over hd directly -- no k.T materialization
            s = lax.dot_general(q, k, (((1,), (1,)), ((), ())),
                                preferred_element_type=jnp.float32)  # (TQ, N)
            s = s - jnp.max(s, axis=-1, keepdims=True)
            e = jnp.exp(s)
            inv = pl.reciprocal(jnp.sum(e, axis=-1, keepdims=True), approx=True)
            a32 = e * inv                                            # softmax
            a_bf = a32.astype(jnp.bfloat16)
            if attn_ref is not None:
                if attn_is_bf16:
                    attn_ref[0, hh, :, :] = a_bf
                else:
                    attn_ref[0, hh, :, :] = a32.astype(attn_ref.dtype)

            out_h = jnp.dot(a_bf, v, preferred_element_type=jnp.float32)
            slab_ref[:, lo:hi] = out_h.astype(jnp.bfloat16)

        slab = slab_ref[...]                         # (TQ, C) bf16
        # full-depth (C/2) projections instead of per-head hd-deep matmuls
        mu = x + jnp.dot(slab[:, :C2], w_mu[...],
                         preferred_element_type=jnp.float32) + b_mu[...]
        ls = jnp.dot(slab[:, C2:], w_ls[...],
                     preferred_element_type=jnp.float32) + b_ls[...]

        # mu = mu + mu_mlp(norm2(mu))
        mu_n = _layernorm(mu, g2[...], be2[...]).astype(jnp.bfloat16)
        mu_h = _gelu(jnp.dot(mu_n, w_m1[...], preferred_element_type=jnp.float32)
                     + b_m1[...]).astype(jnp.bfloat16)
        mu = mu + jnp.dot(mu_h, w_m2[...], preferred_element_type=jnp.float32) + b_m2[...]

        # logsigma = logsigma + logsig_mlp(norm3(logsigma))
        ls_n = _layernorm(ls, g3[...], be3[...]).astype(jnp.bfloat16)
        ls_h = _gelu(jnp.dot(ls_n, w_l1[...], preferred_element_type=jnp.float32)
                     + b_l1[...]).astype(jnp.bfloat16)
        ls = ls + jnp.dot(ls_h, w_l2[...], preferred_element_type=jnp.float32) + b_l2[...]

        mu_ref[0] = mu.astype(mu_ref.dtype)
        ls_ref[0] = ls.astype(ls_ref.dtype)

    return kernel


# ------------------------------------------------------------------ wrapper --
def dis_trans_forward(x, params, num_heads, attn_dtype=jnp.bfloat16,
                      return_attn=True):
    B, N, C = x.shape
    assert C % num_heads == 0 and C % 2 == 0
    hd = C // num_heads
    # NOTE: reproduces the reference module exactly: head_dim = dim * num_heads,
    # so scale = (dim * num_heads) ** -0.5.
    scale = float((C * num_heads) ** -0.5)
    Hm = params["w_m1"].shape[1]
    bf16 = jnp.bfloat16

    single = _pipeline_mode_supported()
    cap = _vmem_capacity_bytes()
    big_vmem = cap > 96 * _MIB
    pw = 1 if single else 2            # weight buffering factor
    kvb = 1 if single else 2           # K/V buffering factor

    # matmul weights in bf16 (MXU operands); biases / LN params stay f32.
    # Attention scale folded into the q columns of w_qkv (free: the weight is
    # already being rewritten by the cast).
    w_qkv = params["w_qkv"]
    w_qkv = jnp.concatenate([w_qkv[:, :C] * scale, w_qkv[:, C:]], axis=1).astype(bf16)
    p_a = [params["w_fc"].astype(bf16), params["b_fc"],
           params["g1"], params["be1"], w_qkv]
    p_b = [params["w_mu"].astype(bf16), params["b_mu"],
           params["w_ls"].astype(bf16), params["b_ls"],
           params["g2"], params["be2"], params["g3"], params["be3"],
           params["w_m1"].astype(bf16), params["b_m1"],
           params["w_m2"].astype(bf16), params["b_m2"],
           params["w_l1"].astype(bf16), params["b_l1"],
           params["w_l2"].astype(bf16), params["b_l2"]]

    # ---- stage A: fc -> gelu -> norm1 -> fused qkv ----
    TS = _pick_seq_tile(N, 512 if big_vmem else 256)
    est_a = (2 * TS * C * 4                 # x block, double-buffered
             + pw * 4 * C * C * 2           # bf16 weights (w_fc + w_qkv)
             + 2 * 3 * TS * C * 2           # q/k/v out blocks, double-buffered
             + (2 * TS * C + TS * 3 * C) * 4)   # f32 temporaries
    q, k, v = pl.pallas_call(
        _make_qkv_kernel(C),
        grid=(B, N // TS),
        in_specs=([pl.BlockSpec((1, TS, C), lambda b, s: (b, s, 0))]
                  + [_const_spec(p, single) for p in p_a]),
        out_specs=(pl.BlockSpec((1, TS, C), lambda b, s: (b, s, 0)),) * 3,
        out_shape=(jax.ShapeDtypeStruct((B, N, C), bf16),) * 3,
        compiler_params=pltpu.CompilerParams(
            dimension_semantics=("parallel", "parallel"),
            vmem_limit_bytes=_vmem_limit(est_a, cap)),
    )(x, *p_a)

    # ---- stage B: attention + projections + residual MLPs ----
    TQ = _pick_seq_tile(N, 256 if big_vmem else 128)
    attn_bytes = jnp.dtype(attn_dtype).itemsize
    est_b = (2 * TQ * C * 4 + 2 * TQ * C * 2               # x + q tiles
             + kvb * 2 * N * C * 2                         # full K/V
             + pw * (C * C + 4 * C * Hm) * 2               # bf16 weights
             + 2 * 2 * TQ * C * 4                          # mu/ls out blocks
             + (2 * num_heads * TQ * N * attn_bytes if return_attn else 0)
             + TQ * C * 2                                  # bf16 slab scratch
             + 4 * TQ * N * 4                              # softmax temporaries
             + 8 * TQ * C * 4 + 2 * TQ * Hm * 4)           # LN / MLP temporaries

    def kv_spec():
        if single:
            # index_map is invariant in the seq-tile axis -> single buffer.
            return pl.BlockSpec((1, N, C), lambda b, t: (b, 0, 0),
                                pipeline_mode=pl.Buffered(1))
        return pl.BlockSpec((1, N, C), lambda b, t: (b, 0, 0))

    out_specs = [pl.BlockSpec((1, TQ, C), lambda b, t: (b, t, 0)),
                 pl.BlockSpec((1, TQ, C), lambda b, t: (b, t, 0))]
    out_shape = [jax.ShapeDtypeStruct((B, N, C), jnp.float32),
                 jax.ShapeDtypeStruct((B, N, C), jnp.float32)]
    if return_attn:
        out_specs.append(pl.BlockSpec((1, num_heads, TQ, N),
                                      lambda b, t: (b, 0, t, 0)))
        out_shape.append(jax.ShapeDtypeStruct((B, num_heads, N, N), attn_dtype))

    outs = pl.pallas_call(
        _make_attn_kernel(num_heads, hd, C, attn_dtype, return_attn),
        grid=(B, N // TQ),
        in_specs=([pl.BlockSpec((1, TQ, C), lambda b, t: (b, t, 0)),   # x (residual)
                   pl.BlockSpec((1, TQ, C), lambda b, t: (b, t, 0)),   # q tile
                   kv_spec(), kv_spec()]                               # full K, V
                  + [_const_spec(p, single) for p in p_b]),
        out_specs=tuple(out_specs),
        out_shape=tuple(out_shape),
        scratch_shapes=[pltpu.VMEM((TQ, C), bf16)],
        compiler_params=pltpu.CompilerParams(
            dimension_semantics=("parallel", "parallel"),
            vmem_limit_bytes=_vmem_limit(est_b, cap)),
    )(x, q, k, v, *p_b)

    if return_attn:
        mu, logsigma, attn = outs
        return mu, logsigma, attn
    mu, logsigma = outs
    return mu, logsigma, None


# --------------------------------------------------------------- reference --
def dis_trans_reference(x, params, num_heads):
    """Pure-JAX f32 reference, same math as the PyTorch module (eval mode)."""
    B, N, C = x.shape
    hd = C // num_heads
    scale = (C * num_heads) ** -0.5
    p = params
    h = _gelu(x @ p["w_fc"] + p["b_fc"])
    xn = _layernorm(h, p["g1"], p["be1"])
    qkv = xn @ p["w_qkv"]                                   # (B, N, 3C)
    qkv = qkv.reshape(B, N, 3, num_heads, hd).transpose(2, 0, 3, 1, 4)
    q, k, v = qkv[0], qkv[1], qkv[2]                        # (B, H, N, hd)
    s = jnp.einsum("bhnd,bhmd->bhnm", q, k) * scale
    a = jax.nn.softmax(s, axis=-1)
    o = jnp.einsum("bhnm,bhmd->bhnd", a, v)                 # (B, H, N, hd)
    o = o.transpose(0, 2, 1, 3).reshape(B, N, C)
    mu = o[:, :, :C // 2] @ p["w_mu"] + p["b_mu"]
    ls = o[:, :, C // 2:] @ p["w_ls"] + p["b_ls"]
    mu = x + mu
    mu = mu + (_gelu(_layernorm(mu, p["g2"], p["be2"]) @ p["w_m1"] + p["b_m1"])
               @ p["w_m2"] + p["b_m2"])
    ls = ls + (_gelu(_layernorm(ls, p["g3"], p["be3"]) @ p["w_l1"] + p["b_l1"])
               @ p["w_l2"] + p["b_l2"])
    return mu, ls, a


def init_params(key, dim, num_heads, mlp_ratio=4.0):
    C = dim
    C2 = C // 2
    Hm = int(C * mlp_ratio)
    ks = jax.random.split(key, 32)

    def w(k, din, dout):
        return jax.random.normal(k, (din, dout), jnp.float32) * 0.02

    def b(k, dout):
        return jax.random.normal(k, (1, dout), jnp.float32) * 0.02

    params = {
        "w_fc": w(ks[0], C, C),   "b_fc": b(ks[1], C),
        "g1": 1.0 + 0.01 * jax.random.normal(ks[2], (1, C), jnp.float32),
        "be1": 0.01 * jax.random.normal(ks[3], (1, C), jnp.float32),
        "w_qkv": w(ks[4], C, 3 * C),
        "w_mu": w(ks[5], C2, C),  "b_mu": b(ks[6], C),
        "w_ls": w(ks[7], C2, C),  "b_ls": b(ks[8], C),
        "g2": 1.0 + 0.01 * jax.random.normal(ks[9], (1, C), jnp.float32),
        "be2": 0.01 * jax.random.normal(ks[10], (1, C), jnp.float32),
        "g3": 1.0 + 0.01 * jax.random.normal(ks[11], (1, C), jnp.float32),
        "be3": 0.01 * jax.random.normal(ks[12], (1, C), jnp.float32),
        "w_m1": w(ks[13], C, Hm), "b_m1": b(ks[14], Hm),
        "w_m2": w(ks[15], Hm, C), "b_m2": b(ks[16], C),
        "w_l1": w(ks[17], C, Hm), "b_l1": b(ks[18], Hm),
        "w_l2": w(ks[19], Hm, C), "b_l2": b(ks[20], C),
    }
    return params


if __name__ == "__main__":
    B, N, C = 2, 8, 32        # batch, seq, dim
    num_heads = 4

    key = jax.random.PRNGKey(0)
    k_x, k_p = jax.random.split(key)
    x = jax.random.normal(k_x, (B, N, C), jnp.float32)
    params = init_params(k_p, C, num_heads)

    mu, logsigma, attn = jax.block_until_ready(
        dis_trans_forward(x, params, num_heads))

    mu_r, ls_r, attn_r = dis_trans_reference(x, params, num_heads)
    assert mu.shape == (B, N, C) and logsigma.shape == (B, N, C)
    assert attn.shape == (B, num_heads, N, N)
    # bf16 MXU operands + bf16 attention output -> looser tolerance than pure f32
    assert jnp.allclose(mu, mu_r, rtol=1e-2, atol=1e-2)
    assert jnp.allclose(logsigma, ls_r, rtol=1e-2, atol=1e-2)
    assert jnp.allclose(attn.astype(jnp.float32), attn_r, rtol=1e-2, atol=1e-2)

    print("KERNEL_OK")
</pallas_src>

<mosaic_0001>
module attributes {stable_mosaic.version = 11 : i64} {
  func.func @_probe_kernel(%arg0: i32, %arg1: memref<8x128xf32, #tpu.memory_space<vmem>>, %arg2: memref<8x128xf32, #tpu.memory_space<vmem>>) attributes {dimension_semantics = [#tpu.dimension_semantics<arbitrary>], iteration_bounds = array<i64: 2>, scalar_prefetch = 0 : i64, scratch_operands = 0 : i64, tpu.core_type = #tpu.core_type<tc>, window_params = [{pipeline_mode = #tpu.pipeline_mode<synchronous>, transform_indices = @transform_0, window_bounds = array<i64: 8, 128>}, {transform_indices = @transform_1, window_bounds = array<i64: 8, 128>}]} {
    %c0 = arith.constant 0 : index
    %c0_0 = arith.constant 0 : index
    %0 = vector.load %arg1[%c0, %c0_0] : memref<8x128xf32, #tpu.memory_space<vmem>>, vector<8x128xf32>
    %cst = arith.constant 1.000000e+00 : f32
    %1 = vector.broadcast %cst : f32 to vector<8x128xf32>
    %2 = arith.addf %0, %1 : vector<8x128xf32>
    %c0_1 = arith.constant 0 : index
    %c0_2 = arith.constant 0 : index
    %3 = vector.load %arg2[%c0_1, %c0_2] : memref<8x128xf32, #tpu.memory_space<vmem>>, vector<8x128xf32>
    tpu.vector_store %arg2[%c0_1, %c0_2], %2 {strides = array<i32>} : memref<8x128xf32, #tpu.memory_space<vmem>>, vector<8x128xf32>,
    return
  }
  func.func @transform_0(%arg0: i32) -> (i32, i32) {
    %c0_i32 = arith.constant 0 : i32
    %c0_i32_0 = arith.constant 0 : i32
    return %arg0, %c0_i32 : i32, i32
  }
  func.func @transform_1(%arg0: i32) -> (i32, i32) {
    %c0_i32 = arith.constant 0 : i32
    %c0_i32_0 = arith.constant 0 : i32
    return %arg0, %c0_i32 : i32, i32
  }
}

module attributes {stable_mosaic.version = 11 : i64} {
  func.func @kernel(%arg0: i32, %arg1: i32, %arg2: memref<1x8x32xf32, #tpu.memory_space<vmem>>, %arg3: memref<32x32xbf16, #tpu.memory_space<vmem>>, %arg4: memref<1x32xf32, #tpu.memory_space<vmem>>, %arg5: memref<1x32xf32, #tpu.memory_space<vmem>>, %arg6: memref<1x32xf32, #tpu.memory_space<vmem>>, %arg7: memref<32x96xbf16, #tpu.memory_space<vmem>>, %arg8: memref<1x8x32xbf16, #tpu.memory_space<vmem>>, %arg9: memref<1x8x32xbf16, #tpu.memory_space<vmem>>, %arg10: memref<1x8x32xbf16, #tpu.memory_space<vmem>>) attributes {dimension_semantics = [#tpu.dimension_semantics<parallel>, #tpu.dimension_semantics<parallel>], iteration_bounds = array<i64: 2, 1>, scalar_prefetch = 0 : i64, scratch_operands = 0 : i64, tpu.core_type = #tpu.core_type<tc>, window_params = [{transform_indices = @transform_0, window_bounds = array<i64: 1, 8, 32>}, {pipeline_mode = #tpu.pipeline_mode<synchronous>, transform_indices = @transform_1, window_bounds = array<i64: 32, 32>}, {pipeline_mode = #tpu.pipeline_mode<synchronous>, transform_indices = @transform_2, window_bounds = array<i64: 1, 32>}, {pipeline_mode = #tpu.pipeline_mode<synchronous>, transform_indices = @transform_3, window_bounds = array<i64: 1, 32>}, {pipeline_mode = #tpu.pipeline_mode<synchronous>, transform_indices = @transform_4, window_bounds = array<i64: 1, 32>}, {pipeline_mode = #tpu.pipeline_mode<synchronous>, transform_indices = @transform_5, window_bounds = array<i64: 32, 96>}, {transform_indices = @transform_6, window_bounds = array<i64: 1, 8, 32>}, {transform_indices = @transform_7, window_bounds = array<i64: 1, 8, 32>}, {transform_indices = @transform_8, window_bounds = array<i64: 1, 8, 32>}]} {
    %c0 = arith.constant 0 : index
    %c0_0 = arith.constant 0 : index
    %c0_1 = arith.constant 0 : index
    %0 = vector.load %arg2[%c0, %c0_0, %c0_1] : memref<1x8x32xf32, #tpu.memory_space<vmem>>, vector<1x8x32xf32>
    %1 = vector.shape_cast %0 : vector<1x8x32xf32> to vector<8x32xf32>
    %2 = arith.truncf %1 : vector<8x32xf32> to vector<8x32xbf16>
    %c0_2 = arith.constant 0 : index
    %c0_3 = arith.constant 0 : index
    %3 = vector.load %arg3[%c0_2, %c0_3] : memref<32x32xbf16, #tpu.memory_space<vmem>>, vector<32x32xbf16>
    %cst = arith.constant dense<0.000000e+00> : vector<8x32xf32>
    %4 = tpu.matmul %2, %3, %cst {dimension_numbers = #tpu.dot_dimension_numbers<[1], [0], [0], [1], [0, 0, 1, 1], [], []>} : vector<8x32xbf16>, vector<32x32xbf16>, vector<8x32xf32> -> vector<8x32xf32>
    %c0_4 = arith.constant 0 : index
    %c0_5 = arith.constant 0 : index
    %5 = vector.load %arg4[%c0_4, %c0_5] : memref<1x32xf32, #tpu.memory_space<vmem>>, vector<1x32xf32>
    %6 = vector.broadcast %5 : vector<1x32xf32> to vector<8x32xf32>
    %7 = arith.addf %4, %6 : vector<8x32xf32>
    %cst_6 = arith.constant 5.000000e-01 : f32
    %8 = vector.broadcast %cst_6 : f32 to vector<8x32xf32>
    %9 = arith.mulf %8, %7 : vector<8x32xf32>
    %cst_7 = arith.constant 0.707106769 : f32
    %10 = vector.broadcast %cst_7 : f32 to vector<8x32xf32>
    %11 = arith.mulf %7, %10 : vector<8x32xf32>
    %12 = math.erf %11 : vector<8x32xf32>
    %cst_8 = arith.constant 1.000000e+00 : f32
    %13 = vector.broadcast %cst_8 : f32 to vector<8x32xf32>
    %14 = arith.addf %13, %12 : vector<8x32xf32>
    %15 = arith.mulf %9, %14 : vector<8x32xf32>
    %c0_9 = arith.constant 0 : index
    %c0_10 = arith.constant 0 : index
    %16 = vector.load %arg5[%c0_9, %c0_10] : memref<1x32xf32, #tpu.memory_space<vmem>>, vector<1x32xf32>
    %c0_11 = arith.constant 0 : index
    %c0_12 = arith.constant 0 : index
    %17 = vector.load %arg6[%c0_11, %c0_12] : memref<1x32xf32, #tpu.memory_space<vmem>>, vector<1x32xf32>
    %cst_13 = arith.constant dense<0.000000e+00> : vector<8xf32>
    %18 = vector.multi_reduction <add>, %15, %cst_13 [1] : vector<8x32xf32> to vector<8xf32>
    %19 = vector.shape_cast %18 : vector<8xf32> to vector<8x1xf32>
    %cst_14 = arith.constant 3.200000e+01 : f32
    %20 = vector.broadcast %cst_14 : f32 to vector<8x1xf32>
    %21 = arith.divf %19, %20 : vector<8x1xf32>
    %22 = vector.broadcast %21 : vector<8x1xf32> to vector<8x32xf32>
    %23 = arith.subf %15, %22 : vector<8x32xf32>
    %24 = arith.mulf %23, %23 : vector<8x32xf32>
    %cst_15 = arith.constant dense<0.000000e+00> : vector<8xf32>
    %25 = vector.multi_reduction <add>, %24, %cst_15 [1] : vector<8x32xf32> to vector<8xf32>
    %26 = vector.shape_cast %25 : vector<8xf32> to vector<8x1xf32>
    %cst_16 = arith.constant 3.200000e+01 : f32
    %27 = vector.broadcast %cst_16 : f32 to vector<8x1xf32>
    %28 = arith.divf %26, %27 : vector<8x1xf32>
    %29 = vector.broadcast %21 : vector<8x1xf32> to vector<8x32xf32>
    %30 = arith.subf %15, %29 : vector<8x32xf32>
    %cst_17 = arith.constant 9.99999974E-6 : f32
    %31 = vector.broadcast %cst_17 : f32 to vector<8x1xf32>
    %32 = arith.addf %28, %31 : vector<8x1xf32>
    %33 = math.rsqrt %32 : vector<8x1xf32>
    %34 = vector.broadcast %33 : vector<8x1xf32> to vector<8x32xf32>
    %35 = arith.mulf %30, %34 : vector<8x32xf32>
    %36 = vector.broadcast %16 : vector<1x32xf32> to vector<8x32xf32>
    %37 = arith.mulf %35, %36 : vector<8x32xf32>
    %38 = vector.broadcast %17 : vector<1x32xf32> to vector<8x32xf32>
    %39 = arith.addf %37, %38 : vector<8x32xf32>
    %40 = arith.truncf %39 : vector<8x32xf32> to vector<8x32xbf16>
    %c0_18 = arith.constant 0 : index
    %c0_19 = arith.constant 0 : index
    %41 = vector.load %arg7[%c0_18, %c0_19] : memref<32x96xbf16, #tpu.memory_space<vmem>>, vector<32x96xbf16>
    %cst_20 = arith.constant dense<0.000000e+00> : vector<8x96xf32>
    %42 = tpu.matmul %40, %41, %cst_20 {dimension_numbers = #tpu.dot_dimension_numbers<[1], [0], [0], [1], [0, 0, 1, 1], [], []>} : vector<8x32xbf16>, vector<32x96xbf16>, vector<8x96xf32> -> vector<8x96xf32>
    %43 = vector.extract_strided_slice %42 {offsets = [0, 0], sizes = [8, 32], strides = [1, 1]} : vector<8x96xf32> to vector<8x32xf32>
    %44 = arith.truncf %43 : vector<8x32xf32> to vector<8x32xbf16>
    %c0_21 = arith.constant 0 : index
    %c0_22 = arith.constant 0 : index
    %c0_23 = arith.constant 0 : index
    %45 = vector.load %arg8[%c0_21, %c0_22, %c0_23] : memref<1x8x32xbf16, #tpu.memory_space<vmem>>, vector<1x8x32xbf16>
    %46 = vector.shape_cast %45 : vector<1x8x32xbf16> to vector<8x32xbf16>
    %47 = vector.shape_cast %44 : vector<8x32xbf16> to vector<1x8x32xbf16>
    tpu.vector_store %arg8[%c0_21, %c0_22, %c0_23], %47 {strides = array<i32>} : memref<1x8x32xbf16, #tpu.memory_space<vmem>>, vector<1x8x32xbf16>,
    %48 = vector.extract_strided_slice %42 {offsets = [0, 32], sizes = [8, 32], strides = [1, 1]} : vector<8x96xf32> to vector<8x32xf32>
    %49 = arith.truncf %48 : vector<8x32xf32> to vector<8x32xbf16>
    %c0_24 = arith.constant 0 : index
    %c0_25 = arith.constant 0 : index
    %c0_26 = arith.constant 0 : index
    %50 = vector.load %arg9[%c0_24, %c0_25, %c0_26] : memref<1x8x32xbf16, #tpu.memory_space<vmem>>, vector<1x8x32xbf16>
    %51 = vector.shape_cast %50 : vector<1x8x32xbf16> to vector<8x32xbf16>
    %52 = vector.shape_cast %49 : vector<8x32xbf16> to vector<1x8x32xbf16>
    tpu.vector_store %arg9[%c0_24, %c0_25, %c0_26], %52 {strides = array<i32>} : memref<1x8x32xbf16, #tpu.memory_space<vmem>>, vector<1x8x32xbf16>,
    %53 = vector.extract_strided_slice %42 {offsets = [0, 64], sizes = [8, 32], strides = [1, 1]} : vector<8x96xf32> to vector<8x32xf32>
    %54 = arith.truncf %53 : vector<8x32xf32> to vector<8x32xbf16>
    %c0_27 = arith.constant 0 : index
    %c0_28 = arith.constant 0 : index
    %c0_29 = arith.constant 0 : index
    %55 = vector.load %arg10[%c0_27, %c0_28, %c0_29] : memref<1x8x32xbf16, #tpu.memory_space<vmem>>, vector<1x8x32xbf16>
    %56 = vector.shape_cast %55 : vector<1x8x32xbf16> to vector<8x32xbf16>
    %57 = vector.shape_cast %54 : vector<8x32xbf16> to vector<1x8x32xbf16>
    tpu.vector_store %arg10[%c0_27, %c0_28, %c0_29], %57 {strides = array<i32>} : memref<1x8x32xbf16, #tpu.memory_space<vmem>>, vector<1x8x32xbf16>,
    return
  }
  func.func @transform_0(%arg0: i32, %arg1: i32) -> (i32, i32, i32) {
    %c0_i32 = arith.constant 0 : i32
    %c0_i32_0 = arith.constant 0 : i32
    return %arg0, %arg1, %c0_i32 : i32, i32, i32
  }
  func.func @transform_1(%arg0: i32, %arg1: i32) -> (i32, i32) {
    %c0_i32 = arith.constant 0 : i32
    %c0_i32_0 = arith.constant 0 : i32
    %c0_i32_1 = arith.constant 0 : i32
    return %c0_i32, %c0_i32_0 : i32, i32
  }
  func.func @transform_2(%arg0: i32, %arg1: i32) -> (i32, i32) {
    %c0_i32 = arith.constant 0 : i32
    %c0_i32_0 = arith.constant 0 : i32
    %c0_i32_1 = arith.constant 0 : i32
    return %c0_i32, %c0_i32_0 : i32, i32
  }
  func.func @transform_3(%arg0: i32, %arg1: i32) -> (i32, i32) {
    %c0_i32 = arith.constant 0 : i32
    %c0_i32_0 = arith.constant 0 : i32
    %c0_i32_1 = arith.constant 0 : i32
    return %c0_i32, %c0_i32_0 : i32, i32
  }
  func.func @transform_4(%arg0: i32, %arg1: i32) -> (i32, i32) {
    %c0_i32 = arith.constant 0 : i32
    %c0_i32_0 = arith.constant 0 : i32
    %c0_i32_1 = arith.constant 0 : i32
    return %c0_i32, %c0_i32_0 : i32, i32
  }
  func.func @transform_5(%arg0: i32, %arg1: i32) -> (i32, i32) {
    %c0_i32 = arith.constant 0 : i32
    %c0_i32_0 = arith.constant 0 : i32
    %c0_i32_1 = arith.constant 0 : i32
    return %c0_i32, %c0_i32_0 : i32, i32
  }
  func.func @transform_6(%arg0: i32, %arg1: i32) -> (i32, i32, i32) {
    %c0_i32 = arith.constant 0 : i32
    %c0_i32_0 = arith.constant 0 : i32
    return %arg0, %arg1, %c0_i32 : i32, i32, i32
  }
  func.func @transform_7(%arg0: i32, %arg1: i32) -> (i32, i32, i32) {
    %c0_i32 = arith.constant 0 : i32
    %c0_i32_0 = arith.constant 0 : i32
    return %arg0, %arg1, %c0_i32 : i32, i32, i32
  }
  func.func @transform_8(%arg0: i32, %arg1: i32) -> (i32, i32, i32) {
    %c0_i32 = arith.constant 0 : i32
    %c0_i32_0 = arith.constant 0 : i32
    return %arg0, %arg1, %c0_i32 : i32, i32, i32
  }
}

</mosaic_0001>

<bundles_post_ra>
// kernel: tpu_custom_call.1
= control target key start
LH: loop header
LB: loop body
LE: loop exit
PB: predicated region body
PF: predicated region fallthrough
CT: control target
= control target key end

     0   :  { %6 = vsyncpa [#allocation3], 0  ;;  %s499_s0 = inlined_call_operand.hbm [shape: f32[16,128], index: 0, kind: input, shape index: {}]   ;;  %s500_s1 = inlined_call_operand.hbm [shape: f32[16,128], index: 1, kind: output, shape index: {}]  }
   0x1   :  { %7 = vsyncpa [#allocation4], 0 }
   0x2   :  { %9 = vsyncpa [#allocation4 + $0x1], 0  ;;  %s358_s6 = smov 0   ;;  %s360_s7 = smov 0  }
   0x3   :  { %s362_s8 = smov 0   ;;  %s364_s9 = smov 0  }
   0x4 LB: > { %s379_s10 = sadd.s32 4294967295, %s344_s9   ;;  %s193_s11 = sadd.s32 4294967294, %s344_s9   ;;  %s344_s9 = sphi %s364_s9, %s517_s9   ;;  %s340_s8 = sphi %s362_s8, %s516_s8   ;;  %s336_s7 = sphi %s360_s7, %s515_s7   ;;  %s332_s6 = sphi %s358_s6, %s514_s6  }
   0x5   : > { %s383_s12 = sadd.s32 1, %s344_s9   ;;  %s22_s13 = sadd.s32 1, %s340_s8 }
   0x6   : > { %s19_s14 = ssub.s32 %s344_s9, %s383_s12  ;;  %p35_p0 = scmp.ne.s32.totalorder %s336_s7, %s332_s6 }
   0x7   : > { %p20_p1 = scmp.eq.s32.totalorder %s19_s14, 0  ;;  %p36_p2 = scmp.eq.s32.totalorder %s379_s10, 0 }
   0x8   : > { %p58_p3 = scmp.ne.s32.totalorder %s340_s8, %s336_s7  ;;  %p59_p4 = scmp.eq.s32.totalorder %s379_s10, 1 }
   0x9   : > { %s395_s15 = scalar_select %p20_p1, %s340_s8, %s22_s13  }
   0xa   : > { %p397_p5 = por %p59_p4, %p58_p3  ;;  %p65_p6 = scmp.eq.s32.totalorder %s193_s11, 1 }
   0xb   : > { %p194_p7 = scmp.ge.s32.totalorder %s344_s9, 1  ;;  %p402_p8 = por %p36_p2, %p35_p0 }
   0xc   : > { %s505_s16 = scalar_select %p397_p5, 1, 0 }
   0xd   : > { %s506_s17 = scalar_select %p402_p8, 1, 0 }
   0xe   : > { %p72_p9 = scmp.lt.s32.totalorder %s344_s9, 3  ;;  %p407_p10 = por %p65_p6, %p35_p0 }
   0xf   : > { %s195_s19 = sshll.u32 %s379_s10, 7  ;;  %s346_s21 = smov [#allocation2]  }
  0x10   : > { %s507_s18 = scalar_select %p407_p10, 1, 0 }
  0x11   : > { %p412_p11 = pnand %p194_p7, %p72_p9  ;;  %s87_s22 = sshll.u32 %s346_s21, 4  ;;  %s88_s22 = int_to_ptr.vmem [resolvable:$true] %s87_s22 }
  0x12   : > { %s85_s25 = scalar_lea.hbm %s499_s0, %s195_s19  ;;  %s253_s30 = scalar_lea.hbm %s499_s0, 256 }
  0x13   : > { %s508_s20 = scalar_select %p412_p11, 1, 0 }
  0x14   : > { %p206_p12 = pneg %p412_p11  ;;  %s248_s27 = scalar_lea.hbm %s85_s25, 128 }
  0x15   : > { %p249_p0 = scmp.ne.s32.totalorder %s85_s25, %s248_s27  ;;  %p254_p4 = scmp.lt.u32.totalorder %s85_s25, %s499_s0 }
  0x16   : > { %p425_p13 = pnand %p206_p12, %p402_p8  ;;  %p255_p6 = scmp.lt.u32.totalorder %s253_s30, %s248_s27 }
  0x17   : > { %p257_p9 = scmp.lt.u32.totalorder %s248_s27, %s85_s25 }
  0x18   : > { %p250_p1 = pneg %p425_p13  ;;  %p256_p7 = por %p255_p6, %p254_p4 }
  0x1a   : > { %p251_p2 = pnand %p250_p1, %p249_p0  ;;  %p258_p12 = por %p257_p9, %p256_p7 }
  0x1c   : > { %p252_p3 = pneg %p251_p2 }
  0x1e   : > { %p259_p10 = pnand %p258_p12, %p252_p3 }
  0x20   : > { %262 = shalt.err (!%p259_p10)
}
  0x21   : > { %s263_s4 = scalar_lea.vmem %s88_s22, 128  ;;  %p271_p8 = scmp.lt.s32.totalorder %s88_s22, %s88_s22 }
  0x22   : > { %p264_p5 = scmp.ne.s32.totalorder %s88_s22, %s263_s4  ;;  %p272_p11 = scmp.lt.s32.totalorder %s263_s4, %s263_s4 }
  0x24   : > { %p266_p0 = pnand %p264_p5, %p250_p1  ;;  %p273_p4 = por %p272_p11, %p271_p8 }
  0x26   : > { %p267_p2 = pneg %p266_p0 }
  0x28   : > { %p274_p6 = pnand %p273_p4, %p267_p2 }
  0x2a   : > { %277 = shalt.err (!%p274_p6)
}
  0x2b   : > { %209 = dma.hbm_to_vmem [thread:$0]  (!%p425_p13), %s85_s25, 128, %s88_s22, [#allocation3]  }
  0x2c   : > { %p510_p7 = scmp.ne.s32.totalorder %s508_s20, 0 }
  0x2d   : > { %p511_p10 = scmp.ne.s32.totalorder (!%p510_p7), %s506_s17, 0 }
  0x2e   : > { %100 = sbr.rel (%p510_p7) target bundleno = 80 (0x50), region = 24 }
  0x35   : > { %323 = dma.done.wait (%p511_p10), [#allocation3], 128  }
  0x36   : > { %325 = vsyncadd (%p511_p10), [#allocation3], 4294967168  ;;  %s112_s5 = sand.u32 1, %s336_s7   ;;  %v115_v0 = vld [vmem:[#allocation2] sm:$0xff]  ;;  %s457_s20 = scalar_lea.hbm %s500_s1, %s195_s19 }
  0x37   : > { %s197_s11 = sshll.u32 %s112_s5, 3  ;;  %v116_v1 = vadd.f32 1.0, %v115_v0  ;;  %s119_s17 = scalar_lea.sflag [#allocation4], %s112_s5 }
  0x38   : > { %s114_s13 = scalar_lea.vmem [#allocation5], %s197_s11  ;;  %p512_p8 = scmp.ne.s32.totalorder %s505_s16, 0 }
  0x39   : > { %s132_s14 = sshll.u32 %s114_s13, 4  ;;  %117 = vst [vmem:[%s114_s13] sm:$0xff] %v116_v1  ;;  %s347_s24 = smov [#allocation5]   ;;  %s459_s14 = int_to_ptr.vmem [resolvable:$true] %s132_s14 }
  0x3a   : > { %s278_s23 = scalar_lea.vmem %s459_s14, 128  ;;  %s282_s10 = sshll.u32 %s347_s24, 4  ;;  %s283_s10 = int_to_ptr.vmem [resolvable:$false] %s282_s10 }
  0x3b   : > { %p279_p5 = scmp.ne.s32.totalorder %s459_s14, %s278_s23  ;;  %s284_s25 = scalar_lea.vmem %s283_s10, 256 }
  0x3c   : > { %p285_p1 = scmp.lt.s32.totalorder %s459_s14, %s283_s10  ;;  %p286_p3 = scmp.lt.s32.totalorder %s284_s25, %s278_s23 }
  0x3d   : > { %p280_p11 = pnand %p279_p5, %p512_p8 }
  0x3e   : > { %p287_p9 = por %p286_p3, %p285_p1 }
  0x3f   : > { %p281_p13 = pneg %p280_p11 }
  0x41   : > { %p288_p12 = pnand %p287_p9, %p281_p13 }
  0x43   : > { %291 = shalt.err (!%p288_p12)
}
  0x44   : > { %s292_s19 = scalar_lea.hbm %s457_s20, 128  ;;  %s296_s28 = scalar_lea.hbm %s500_s1, 256 }
  0x45   : > { %p293_p0 = scmp.ne.s32.totalorder %s457_s20, %s292_s19  ;;  %p297_p6 = scmp.lt.u32.totalorder %s457_s20, %s500_s1 }
  0x46   : > { %p298_p7 = scmp.lt.u32.totalorder %s296_s28, %s292_s19  ;;  %p300_p5 = scmp.lt.u32.totalorder %s292_s19, %s457_s20 }
  0x47   : > { %p294_p2 = pnand %p293_p0, %p512_p8 }
  0x48   : > { %p299_p10 = por %p298_p7, %p297_p6 }
  0x49   : > { %p295_p4 = pneg %p294_p2 }
  0x4a   : > { %p301_p11 = por %p300_p5, %p299_p10 }
  0x4c   : > { %p302_p13 = pnand %p301_p11, %p295_p4 }
  0x4e   : > { %305 = shalt.err (!%p302_p13)
}
  0x4f   : > { %204 = dma.vmem_to_hbm [thread:$0]  (%p512_p8), %s459_s14, 128, %s457_s20, %s119_s17  }
  0x50 PF: > { %p214_p1 = scmp.ge.s32.totalorder %s344_s9, 2  ;;  %s144_s2 = sand.u32 1, %s332_s6  }
  0x51   : > { %p513_p3 = scmp.ne.s32.totalorder %s507_s18, 0  ;;  %s145_s3 = scalar_lea.sflag [#allocation4], %s144_s2 }
  0x53   : > { %p211_p9 = pnand %p214_p1, %p513_p3 }
  0x55   : > { %327 = dma.done.wait (!%p211_p9), %s145_s3, 128  }
  0x56   : > { %329 = vsyncadd (!%p211_p9), %s145_s3, 4294967168  ;;  %p12_p12 = scmp.ge.s32.totalorder %s383_s12, 4   ;;  %s514_s6 = smov %s336_s7 }
  0x57   : > { %s515_s7 = smov %s340_s8  ;;  %s516_s8 = smov %s395_s15 }
  0x58   : > { %s517_s9 = smov %s383_s12  ;;  %14 = sbr.rel (!%p12_p12) target bundleno = 4 (0x4), region = 62 }
  0x5f   :  { %150 = vsyncpa [#allocation3], 1 }
  0x60   :  { %152 = vsyncpa [#allocation3 + $0x1], 1 }
  0x61   :  { %153 = vsyncpa [#allocation4], 1 }
  0x62   :  { %155 = vsyncpa [#allocation4 + $0x1], 1 }

// kernel: tpu_custom_call.1
= control target key start
LH: loop header
LB: loop body
LE: loop exit
PB: predicated region body
PF: predicated region fallthrough
CT: control target
= control target key end

     0   :  { %14 = vsyncpa [#allocation3], 0  ;;  %s1584_s0 = inlined_call_operand.hbm [shape: f32[2,8,32], index: 0, kind: input, shape index: {}]   ;;  %s1585_s1 = inlined_call_operand.hbm [shape: bf16[32,32], index: 1, kind: input, shape index: {}]   ;;  %s1586_s2 = inlined_call_operand.vmem [shape: f32[1,32], index: 2, kind: input, shape index: {}]   ;;  %s1587_s3 = inlined_call_operand.vmem [shape: f32[1,32], index: 3, kind: input, shape index: {}]   ;;  %s1588_s4 = inlined_call_operand.hbm [shape: f32[1,32], index: 4, kind: input, shape index: {}]   ;;  %s1589_s5 = inlined_call_operand.vmem [shape: bf16[32,96], index: 5, kind: input, shape index: {}]   ;;  %s1590_s6 = inlined_call_operand.hbm [shape: bf16[2,8,32], index: 6, kind: output, shape index: {0}]   ;;  %s1591_s7 = inlined_call_operand.hbm [shape: bf16[2,8,32], index: 7, kind: output, shape index: {1}]   ;;  %s1592_s8 = inlined_call_operand.hbm [shape: bf16[2,8,32], index: 8, kind: output, shape index: {2}]  }
   0x1   :  { %16 = vsyncpa [#allocation3 + $0x1], 0 }
   0x2   :  { %17 = vsyncpa [#allocation6], 0 }
   0x3   :  { %18 = vsyncpa [#allocation4], 0 }
   0x4   :  { %20 = vsyncpa [#allocation4 + $0x1], 0 }
   0x5   :  { %21 = vsyncpa [#allocation10], 0 }
   0x6   :  { %23 = vsyncpa [#allocation10 + $0x1], 0  ;;  %s1235_s27 = smov 0   ;;  %s1237_s28 = smov 0  }
   0x7   :  { %s1239_s29 = smov 0   ;;  %s1241_s30 = smov 0  }
   0x8   :  { %s1243_s9 = smov 0   ;;  %s1245_s10 = smov 0  }
   0x9 LB: > { %1599 = sst [smem:[#allocation16_spill]] %s1156_s27  ;;  %s1266_s11 = sadd.s32 4294967295, %s1176_s10   ;;  %s1176_s10 = sphi %s1245_s10, %s29_s10   ;;  %s1172_s9 = sphi %s1243_s9, %s1621_s9   ;;  %s1168_s30 = sphi %s1241_s30, %s1620_s30   ;;  %s1164_s29 = sphi %s1239_s29, %s1619_s29   ;;  %s1160_s28 = sphi %s1237_s28, %s1618_s28   ;;  %s1156_s27 = sphi %s1235_s27, %s1617_s27  }
   0xa   : > { %s1594_s12 = sadd.s32 4294967294, %s1176_s10   ;;  %p63_p0 = scmp.ne.s32.totalorder %s1160_s28, %s1156_s27 }
   0xb   : > { %p1593_p1 = scmp.eq.s32.totalorder %s1266_s11, 0  ;;  %p200_p3 = scmp.eq.s32.totalorder %s1594_s12, 1 }
   0xc   : > { %p783_p5 = scmp.ge.s32.totalorder %s1176_s10, 1  ;;  %p263_p7 = scmp.lt.s32.totalorder %s1176_s10, 3 }
   0xd   : > { %p1277_p4 = por %p1593_p1, %p63_p0  ;;  %p1282_p6 = por %p200_p3, %p63_p0 }
   0xe   : > { %p1287_p8 = pnand %p783_p5, %p263_p7  ;;  %s1178_s16 = smov [#allocation5]  }
   0xf   : > { %s1600_s13 = scalar_select %p1277_p4, 1, 0 }
  0x10   : > { %s1601_s14 = scalar_select %p1282_p6, 1, 0 }
  0x11   : > { %s275_s17 = sshll.u32 %s1178_s16, 4  ;;  %p853_p9 = pneg %p1287_p8  ;;  %s1291_s17 = int_to_ptr.vmem [resolvable:$true] %s275_s17 }
  0x12   : > { %1602 = sst [smem:[#allocation17_spill]] %s1601_s14  ;;  %s1179_s19 = smov [#allocation7]  }
  0x13   : > { %p1298_p11 = pnand %p853_p9, %p1593_p1  ;;  %s295_s20 = sshll.u32 %s1179_s19, 4  ;;  %s1302_s20 = int_to_ptr.vmem [resolvable:$true] %s295_s20 }
  0x14   : > { %s944_s23 = scalar_lea.hbm %s1585_s1, 256 }
  0x15   : > { %p945_p12 = scmp.ne.s32.totalorder %s1585_s1, %s944_s23  ;;  %p946_p13 = pneg %p1298_p11 }
  0x16   : > { %p951_p5 = scmp.lt.u32.totalorder %s944_s23, %s1585_s1 }
  0x17   : > { %p947_p0 = pnand %p946_p13, %p945_p12 }
  0x19   : > { %p948_p3 = pneg %p947_p0 }
  0x1b   : > { %p953_p7 = pnand %p951_p5, %p948_p3 }
  0x1d   : > { %956 = shalt.err (!%p953_p7)
}
  0x1e   : > { %s957_s19 = scalar_lea.vmem %s1291_s17, 256  ;;  %p965_p2 = scmp.lt.s32.totalorder %s1291_s17, %s1291_s17 }
  0x1f   : > { %p958_p9 = scmp.ne.s32.totalorder %s1291_s17, %s957_s19  ;;  %p966_p12 = scmp.lt.s32.totalorder %s957_s19, %s957_s19 }
  0x21   : > { %p960_p10 = pnand %p958_p9, %p946_p13  ;;  %p967_p0 = por %p966_p12, %p965_p2 }
  0x23   : > { %p961_p1 = pneg %p960_p10 }
  0x25   : > { %p968_p6 = pnand %p967_p0, %p961_p1 }
  0x27   : > { %971 = shalt.err (!%p968_p6)
}
  0x28   : > { %s1180_s21 = smov 64   ;;  %s1181_s22 = smov 4  }
  0x29   : > { %856 = dma.hbm_to_vmem [thread:$0]  (!%p1298_p11), %s1585_s1, 256, %s1291_s17, [#allocation6], %s1180_s21, %s1180_s21, %s1181_s22  }
  0x2a   : > { %s972_s16 = scalar_lea.hbm %s1588_s4, 16 }
  0x2b   : > { %p973_p2 = scmp.ne.s32.totalorder %s1588_s4, %s972_s16  ;;  %p979_p10 = scmp.lt.u32.totalorder %s972_s16, %s1588_s4 }
  0x2d   : > { %p975_p1 = pnand %p973_p2, %p946_p13 }
  0x2f   : > { %p976_p6 = pneg %p975_p1 }
  0x31   : > { %p981_p3 = pnand %p979_p10, %p976_p6 }
  0x33   : > { %984 = shalt.err (!%p981_p3)
}
  0x34   : > { %s985_s17 = scalar_lea.vmem %s1302_s20, 16  ;;  %s992_s12 = scalar_lea.vmem %s1302_s20, 32 }
  0x35   : > { %p986_p5 = scmp.ne.s32.totalorder %s1302_s20, %s985_s17  ;;  %p993_p12 = scmp.lt.s32.totalorder %s1302_s20, %s1302_s20 }
  0x36   : > { %p994_p0 = scmp.lt.s32.totalorder %s992_s12, %s985_s17 }
  0x37   : > { %p988_p7 = pnand %p986_p5, %p946_p13 }
  0x38   : > { %p995_p2 = por %p994_p0, %p993_p12 }
  0x39   : > { %p989_p9 = pneg %p988_p7 }
  0x3b   : > { %p996_p1 = pnand %p995_p2, %p989_p9 }
  0x3d   : > { %999 = shalt.err (!%p996_p1)
}
  0x3e   : > { %859 = dma.hbm_to_vmem [thread:$0]  (!%p1298_p11), %s1588_s4, 16, %s1302_s20, [#allocation6]  }
  0x3f   : > { %s41_s21 = sadd.s32 1, %s1172_s9  ;;  %s50_s22 = sadd.s32 1, %s1164_s29 }
  0x40   : > { %p43_p13 = scmp.ge.s32.totalorder %s41_s21, 2  ;;  %p57_p6 = scmp.ne.s32.totalorder %s1164_s29, %s1160_s28 }
  0x41   : > { %p58_p10 = scmp.eq.s32.totalorder %s1176_s10, 0  ;;  %p876_p3 = scmp.lt.s32.totalorder %s1176_s10, 2 }
  0x42   : > { %s1623_s21 = smov (%p43_p13, %s41_s21), 0  ;;  %p1605_p7 = scmp.eq.s32.totalorder %s1266_s11, 1 }
  0x43   : > { %p59_p5 = por %p58_p10, %p57_p6  ;;  %s45_s23 = ssub.s32 %s1172_s9, %s1623_s21 }
  0x44   : > { %p1367_p9 = por %p1605_p7, %p57_p6  ;;  %s309_s24 = sand.u32 1, %s1164_s29  }
  0x45   : > { %p48_p12 = scmp.eq.s32.totalorder %s45_s23, 0  ;;  %s787_s20 = sshll.u32 %s309_s24, 3 }
  0x46   : > { %s1606_s18 = scalar_select %p1367_p9, 1, 0 }
  0x47   : > { %s788_s25 = sshll.u32 %s1172_s9, 7  ;;  %s313_s12 = scalar_lea.vmem [#allocation2], %s787_s20 }
  0x48   : > { %s1376_s26 = scalar_select %p48_p12, %s1164_s29, %s50_s22  }
  0x49   : > { %s1381_s17 = scalar_lea.hbm %s1584_s0, %s788_s25  ;;  %s321_s27 = sshll.u32 %s313_s12, 4  ;;  %s1389_s27 = int_to_ptr.vmem [resolvable:$true] %s321_s27 }
  0x4a   : > { %p1385_p11 = pnand %p876_p3, %p59_p5  ;;  %s310_s22 = scalar_lea.sflag [#allocation3], %s309_s24 }
  0x4b   : > { %s1000_s23 = scalar_lea.hbm %s1381_s17, 128  ;;  %s1005_s16 = scalar_lea.hbm %s1584_s0, 256 }
  0x4c   : > { %p1001_p0 = scmp.ne.s32.totalorder %s1381_s17, %s1000_s23  ;;  %p1002_p2 = pneg %p1385_p11 }
  0x4d   : > { %p1006_p6 = scmp.lt.u32.totalorder %s1381_s17, %s1584_s0  ;;  %p1007_p10 = scmp.lt.u32.totalorder %s1005_s16, %s1000_s23 }
  0x4e   : > { %p1003_p1 = pnand %p1002_p2, %p1001_p0  ;;  %p1009_p5 = scmp.lt.u32.totalorder %s1000_s23, %s1381_s17 }
  0x4f   : > { %p1008_p3 = por %p1007_p10, %p1006_p6 }
  0x50   : > { %p1004_p13 = pneg %p1003_p1 }
  0x51   : > { %p1010_p7 = por %p1009_p5, %p1008_p3 }
  0x53   : > { %p1011_p12 = pnand %p1010_p7, %p1004_p13 }
  0x55   : > { %1014 = shalt.err (!%p1011_p12)
}
  0x56   : > { %s1015_s24 = scalar_lea.vmem %s1389_s27, 128  ;;  %s1182_s20 = smov [#allocation2]  }
  0x57   : > { %p1016_p0 = scmp.ne.s32.totalorder %s1389_s27, %s1015_s24  ;;  %s1020_s25 = sshll.u32 %s1182_s20, 4  ;;  %s1021_s25 = int_to_ptr.vmem [resolvable:$false] %s1020_s25 }
  0x58   : > { %s1022_s19 = scalar_lea.vmem %s1021_s25, 256  ;;  %p1023_p4 = scmp.lt.s32.totalorder %s1389_s27, %s1021_s25 }
  0x59   : > { %p1018_p1 = pnand %p1016_p0, %p1002_p2  ;;  %p1024_p6 = scmp.lt.s32.totalorder %s1022_s19, %s1015_s24 }
  0x5b   : > { %p1019_p9 = pneg %p1018_p1  ;;  %p1025_p10 = por %p1024_p6, %p1023_p4 }
  0x5d   : > { %p1026_p3 = pnand %p1025_p10, %p1019_p9 }
  0x5f   : > { %1029 = shalt.err (!%p1026_p3)
}
  0x60   : > { %863 = dma.hbm_to_vmem [thread:$0]  (!%p1385_p11), %s1381_s17, 128, %s1389_s27, %s310_s22  }
  0x61   : > { %330 = sbr.rel (%p1287_p8) target bundleno = 1030 (0x406), region = 44  ;;  %s1419_s23 = sand.u32 (!%p1287_p8), 1, %s1160_s28  }
  0x62   : > { %s790_s16 = sshll.u32 (!%p1287_p8), %s1419_s23, 3  ;;  %s333_s12 = scalar_lea.sflag (!%p1287_p8), [#allocation3], %s1419_s23 }
  0x63   : > { %s336_s24 = scalar_lea.vmem (!%p1287_p8), [#allocation2], %s790_s16  ;;  %p1608_p4 = scmp.ne.s32.totalorder (!%p1287_p8), %s1600_s13, 0 }
  0x68   : > { %1139 = dma.done.wait (%p1608_p4), %s333_s12, 128  }
  0x69   : > { %1141 = vsyncadd (%p1608_p4), %s333_s12, 4294967168  ;;  %p1609_p9 = scmp.eq.s32.totalorder %s1266_s11, 0 }
  0x6b   : > { %1143 = dma.done.wait (%p1609_p9), [#allocation6], 272   ;;  %p1610_p11 = pmov %p1609_p9 }
  0x6c   : > { %v1183_v0 = vmov 0.0   ;;  %vm1184_vm0 = vmmov 0   ;;  %v936_v1 = vld [vmem:[#allocation5] sm:$0xff]   ;;  %v937_v2 = vld [vmem:[#allocation5 + $0x8] sm:$0xff]   ;;  %v388_v3 = vld [vmem:[%s336_s24] sm:$0xff]  ;;  %vm413_vm1 = vcmask 261120  }
  0x6d   : > { %1145 = vsyncadd (%p1610_p11), [#allocation6], 4294967024  ;;  %821 = vmatprep.subr.bf16.mxu0 %v1183_v0  ;;  %825 = vmatprep.mubr.msk.bf16.mxu0 %vm1184_vm0, %v1183_v0  ;;  %v389_v4 = vpack.c.bf16 %v388_v3, %v388_v3  ;;  %v796_v5 = vld [vmem:[%s1586_s2] ss:$0 sm:$0xff]  ;;  %v939_v23 = vld [vmem:[%s1589_s5 + $0x8] sm:$0xff]   ;;  %s1448_s19 = sshll.u32 %s1419_s23, 2 }
  0x6e   : > { %829 = vmatprep.subr.bf16.mxu1 %v1183_v0  ;;  %833 = vmatprep.mubr.msk.bf16.mxu1 %vm1184_vm0, %v1183_v0  ;;  %v938_v22 = vld [vmem:[%s1589_s5] sm:$0xff]   ;;  %s1451_s16 = sshll.u32 %s1168_s30, 6  ;;  %s372_s12 = scalar_lea.vmem [#allocation8], %s1448_s19  ;;  %vm553_vm2 = vcmask 257024  }
  0x6f   : > { %822 = vmatpush3.bf16.msra.mxu0 %v936_v1  ;;  %830 = vmatpush3.bf16.msra.mxu1 %v938_v22  ;;  %v800_v28 = vld [vmem:[%s1587_s3] ss:$0 sm:$0xff]  ;;  %s591_s24 = sshll.u32 %s372_s12, 4  ;;  %s1458_s17 = scalar_lea.hbm %s1590_s6, %s1451_s16  ;;  %s1460_s24 = int_to_ptr.vmem [resolvable:$true] %s591_s24 }
  0x70   : > { %823 = vmatprep.subr.bf16.mxu0 %v1183_v0  ;;  %831 = vmatprep.subr.bf16.mxu1 %v1183_v0  ;;  %v801_v30 = vld [vmem:[#allocation7] ss:$0 sm:$0xff]  ;;  %s1185_s30 = smov 96   ;;  %s567_s27 = scalar_lea.sflag [#allocation4], %s1419_s23 }
  0x71   : > { %s1030_s14 = scalar_lea.vmem %s1460_s24, 64  ;;  %p1611_p2 = scmp.ne.s32.totalorder %s1606_s18, 0 }
  0x72   : > { %p1031_p8 = scmp.ne.s32.totalorder %s1460_s24, %s1030_s14  ;;  %s1186_s22 = smov [#allocation8]  }
  0x73   : > { %824 = vmatpush3.bf16.msra.mxu0 %v937_v2  ;;  %832 = vmatpush3.bf16.msra.mxu1 %v939_v23  ;;  %s1034_s20 = sshll.u32 %s1186_s22, 4  ;;  %s1035_s20 = int_to_ptr.vmem [resolvable:$false] %s1034_s20 }
  0x74   : > { %p1032_p13 = pnand %p1031_p8, %p1611_p2  ;;  %s1036_s25 = scalar_lea.vmem %s1035_s20, 128 }
  0x75   : > { %p1037_p7 = scmp.lt.s32.totalorder %s1460_s24, %s1035_s20  ;;  %p1038_p12 = scmp.lt.s32.totalorder %s1036_s25, %s1030_s14 }
  0x76   : > { %826 = vmatmul.mubr.msk.bf16.vlgmr.msra.gmra.mrb[0].mxu0 %vm413_vm1, %v389_v4  ;;  %p1033_p5 = pneg %p1032_p13 }
  0x77   : > { %p1039_p0 = por %p1038_p12, %p1037_p7 }
  0x79   : > { %p1040_p1 = pnand %p1039_p0, %p1033_p5 }
 0x149   : > { %v451_v6 = vpop.f32.mrb[0].mxu0 }
 0x14a   : > { %v452_v7 = vadd.f32 %v796_v5, %v451_v6  ;;  %v827_v8 = vpop.f32.mrb[1].mxu0 }
 0x14b   : > { %v454_v9 = vpop.f32.mrb[2].mxu0 }
 0x14c   : > { %v458_v10 = vmul.f32 0.70710677, %v452_v7  ;;  %v828_v11 = vpop.f32.mrb[3].mxu0  ;;  %v457_v13 = vmul.f32 0.5, %v452_v7 }
 0x14e   : > { %940 = verf.f32 %v458_v10 }
 0x158   : > { %v941_v12 = vpop.eup %940 }
 0x159   : > { %v460_v14 = vadd.f32 1.0, %v941_v12 }
 0x15b   : > { %v461_v15 = vmul.f32 %v460_v14, %v457_v13 }
 0x15d   : > { %v464_v16 = vsel %vm413_vm1, %v461_v15, 0.0 }
 0x15e   : > { %465 = vadd.xlane.f32.xlu0 %v464_v16 }
 0x1eb   : > { %v466_v17 = vpop.xlane.xlu0 %465 }
 0x1ec   : > { %v468_v18 = vmul.f32 0.03125, %v466_v17 }
 0x1ee   : > { %v469_v19 = vsub.f32 %v461_v15, %v468_v18 }
 0x1f0   : > { %v470_v20 = vmul.f32 %v469_v19, %v469_v19 }
 0x1f2   : > { %v471_v21 = vsel %vm413_vm1, %v470_v20, 0.0 }
 0x1f3   : > { %472 = vadd.xlane.f32.xlu0 %v471_v21 }
 0x280   : > { %v473_v24 = vpop.xlane.xlu0 %472 }
 0x281   : > { %v474_v25 = vmul.f32 0.03125, %v473_v24 }
 0x283   : > { %v475_v26 = vadd.f32 1e-05, %v474_v25 }
 0x285   : > { %942 = vrsqrt.f32 %v475_v26 }
 0x28f   : > { %v943_v27 = vpop.eup %942 }
 0x290   : > { %v477_v29 = vmul.f32 %v943_v27, %v469_v19 }
 0x292   : > { %v484_v31 = vmul.f32 %v800_v28, %v477_v29 }
 0x294   : > { %v491_v32 = vadd.f32 %v801_v30, %v484_v31 }
 0x296   : > { %v492_v33 = vpack.c.bf16 %v491_v32, %v491_v32 }
 0x298   : > { %834 = vmatmul.mubr.msk.bf16.vlgmr.msra.gmra.mrb[0].mxu1 %vm413_vm1, %v492_v33 }
 0x36b   : > { %v546_v34 = vpop.f32.mrb[0].mxu1 }
 0x36c   : > { %v552_v35 = vpack.c.bf16 %v546_v34, %v546_v34  ;;  %v835_v36 = vpop.f32.mrb[1].mxu1 }
 0x36d   : > { %v549_v37 = vpop.f32.mrb[2].mxu1 }
 0x36e   : > { %558 = vrot.lane.b32.xlu1 %v552_v35, %s1185_s30  ;;  %v836_v38 = vpop.f32.mrb[3].mxu1  ;;  %554 = vst.msk [vmem:[%s372_s12] sm:$0xf] %vm553_vm2, %v552_v35 }
 0x36f   : > { %1043 = shalt.err (!%p1040_p1)
}
 0x370   : > { %s1044_s23 = scalar_lea.hbm %s1458_s17, 64  ;;  %s1048_s15 = scalar_lea.hbm %s1590_s6, 128 }
 0x371   : > { %p1045_p6 = scmp.ne.s32.totalorder %s1458_s17, %s1044_s23  ;;  %p1049_p4 = scmp.lt.u32.totalorder %s1458_s17, %s1590_s6 }
 0x372   : > { %p1050_p9 = scmp.lt.u32.totalorder %s1048_s15, %s1044_s23  ;;  %p1052_p8 = scmp.lt.u32.totalorder %s1044_s23, %s1458_s17 }
 0x373   : > { %p1046_p10 = pnand %p1045_p6, %p1611_p2 }
 0x374   : > { %p1051_p11 = por %p1050_p9, %p1049_p4 }
 0x375   : > { %p1047_p3 = pneg %p1046_p10 }
 0x376   : > { %p1053_p13 = por %p1052_p8, %p1051_p11 }
 0x378   : > { %p1054_p5 = pnand %p1053_p13, %p1047_p3 }
 0x37a   : > { %1057 = shalt.err (!%p1054_p5)
}
 0x37b   : > { %847 = dma.vmem_to_hbm [thread:$0]  (%p1611_p2), %s1460_s24, 64, %s1458_s17, %s567_s27  }
 0x37c   : > { %s1187_s14 = smov 64   ;;  %s571_s20 = sand.u32 1, %s1266_s11  }
 0x37d   : > { %562 = vrot.lane.b32.xlu1 %v552_v35, %s1187_s14  ;;  %s379_s25 = scalar_lea.vmem [#allocation9], %s1448_s19  ;;  %s1491_s15 = scalar_lea.hbm %s1591_s7, %s1451_s16 }
 0x37e   : > { %s605_s12 = sshll.u32 %s379_s25, 4  ;;  %s386_s30 = scalar_lea.vmem [#allocation11], %s1448_s19  ;;  %s1493_s12 = int_to_ptr.vmem [resolvable:$true] %s605_s12 }
 0x37f   : > { %s1498_s22 = sshll.u32 %s386_s30, 4  ;;  %s1501_s11 = scalar_lea.sflag [#allocation10], %s571_s20  ;;  %s1532_s22 = int_to_ptr.vmem [resolvable:$true] %s1498_s22 }
 0x380   : > { %s1058_s24 = scalar_lea.vmem %s1493_s12, 64  ;;  %s1188_s17 = smov [#allocation9]  }
 0x381   : > { %p1059_p7 = scmp.ne.s32.totalorder %s1493_s12, %s1058_s24  ;;  %s1062_s27 = sshll.u32 %s1188_s17, 4  ;;  %s1063_s27 = int_to_ptr.vmem [resolvable:$false] %s1062_s27 }
 0x382   : > { %s1064_s14 = scalar_lea.vmem %s1063_s27, 128  ;;  %p1065_p1 = scmp.lt.s32.totalorder %s1493_s12, %s1063_s27 }
 0x383   : > { %p1060_p12 = pnand %p1059_p7, %p1611_p2  ;;  %p1066_p6 = scmp.lt.s32.totalorder %s1064_s14, %s1058_s24 }
 0x385   : > { %p1061_p0 = pneg %p1060_p12  ;;  %p1067_p10 = por %p1066_p6, %p1065_p1 }
 0x387   : > { %p1068_p3 = pnand %p1067_p10, %p1061_p0 }
 0x3e0   : > { %v559_v39 = vpop.permute.xlu1 %558 }
 0x3e1   : > { %561 = vst.msk [vmem:[%s379_s25] sm:$0xf] %vm553_vm2, %v559_v39 }
 0x3e2   : > { %1071 = shalt.err (!%p1068_p3)
}
 0x3e3   : > { %s1072_s20 = scalar_lea.hbm %s1491_s15, 64  ;;  %s1076_s13 = scalar_lea.hbm %s1591_s7, 128 }
 0x3e4   : > { %p1073_p4 = scmp.ne.s32.totalorder %s1491_s15, %s1072_s20  ;;  %p1077_p8 = scmp.lt.u32.totalorder %s1491_s15, %s1591_s7 }
 0x3e5   : > { %p1078_p13 = scmp.lt.u32.totalorder %s1076_s13, %s1072_s20  ;;  %p1080_p7 = scmp.lt.u32.totalorder %s1072_s20, %s1491_s15 }
 0x3e6   : > { %p1074_p9 = pnand %p1073_p4, %p1611_p2 }
 0x3e7   : > { %p1079_p5 = por %p1078_p13, %p1077_p8 }
 0x3e8   : > { %p1075_p11 = pneg %p1074_p9 }
 0x3e9   : > { %p1081_p12 = por %p1080_p7, %p1079_p5 }
 0x3eb   : > { %p1082_p0 = pnand %p1081_p12, %p1075_p11 }
 0x3ed   : > { %1085 = shalt.err (!%p1082_p0)
}
 0x3ee   : > { %848 = dma.vmem_to_hbm [thread:$0]  (%p1611_p2), %s1493_s12, 64, %s1491_s15, %s1501_s11  }
 0x3ef   : > { %s1529_s25 = scalar_lea.hbm %s1592_s8, %s1451_s16  ;;  %v563_v40 = vpop.permute.xlu1 %562  ;;  %s1086_s20 = scalar_lea.vmem %s1532_s22, 64 }
 0x3f0   : > { %565 = vst.msk [vmem:[%s386_s30] sm:$0xf] %vm553_vm2, %v563_v40  ;;  %p1087_p1 = scmp.ne.s32.totalorder %s1532_s22, %s1086_s20  ;;  %s1189_s12 = smov [#allocation11]  }
 0x3f1   : > { %s1090_s15 = sshll.u32 %s1189_s12, 4  ;;  %s1091_s15 = int_to_ptr.vmem [resolvable:$false] %s1090_s15 }
 0x3f2   : > { %p1088_p6 = pnand %p1087_p1, %p1611_p2  ;;  %s1092_s23 = scalar_lea.vmem %s1091_s15, 128 }
 0x3f3   : > { %p1093_p3 = scmp.lt.s32.totalorder %s1532_s22, %s1091_s15  ;;  %p1094_p4 = scmp.lt.s32.totalorder %s1092_s23, %s1086_s20 }
 0x3f4   : > { %p1089_p10 = pneg %p1088_p6 }
 0x3f5   : > { %p1095_p9 = por %p1094_p4, %p1093_p3 }
 0x3f7   : > { %p1096_p11 = pnand %p1095_p9, %p1089_p10 }
 0x3f9   : > { %1099 = shalt.err (!%p1096_p11)
}
 0x3fa   : > { %s1100_s19 = scalar_lea.hbm %s1529_s25, 64  ;;  %s1104_s13 = scalar_lea.hbm %s1592_s8, 128 }
 0x3fb   : > { %p1101_p8 = scmp.ne.s32.totalorder %s1529_s25, %s1100_s19  ;;  %p1105_p7 = scmp.lt.u32.totalorder %s1529_s25, %s1592_s8 }
 0x3fc   : > { %p1106_p12 = scmp.lt.u32.totalorder %s1104_s13, %s1100_s19  ;;  %p1108_p1 = scmp.lt.u32.totalorder %s1100_s19, %s1529_s25 }
 0x3fd   : > { %p1102_p13 = pnand %p1101_p8, %p1611_p2 }
 0x3fe   : > { %p1107_p0 = por %p1106_p12, %p1105_p7 }
 0x3ff   : > { %p1103_p5 = pneg %p1102_p13 }
 0x400   : > { %p1109_p6 = por %p1108_p1, %p1107_p0 }
 0x402   : > { %p1110_p10 = pnand %p1109_p6, %p1103_p5 }
 0x404   : > { %1113 = shalt.err (!%p1110_p10)
}
 0x405   : > { %849 = dma.vmem_to_hbm [thread:$0]  (%p1611_p2), %s1532_s22, 64, %s1529_s25, %s1501_s11  }
 0x406 PF: > { %s1612_s24 = sld [smem:[#allocation16_spill]]  ;;  %s1613_s14 = sld [smem:[#allocation17_spill]] }
 0x407   : > { %p1615_p4 = scmp.ge.s32.totalorder %s1176_s10, 2 }
 0x40c   : > { %s631_s20 = sand.u32 1, %s1612_s24   ;;  %p1614_p3 = scmp.ne.s32.totalorder %s1613_s14, 0 }
 0x40d   : > { %s632_s12 = scalar_lea.sflag [#allocation4], %s631_s20 }
 0x40e   : > { %p865_p9 = pnand %p1615_p4, %p1614_p3 }
 0x410   : > { %1147 = dma.done.wait (!%p865_p9), %s632_s12, 64  }
 0x411   : > { %1149 = vsyncadd (!%p865_p9), %s632_s12, 4294967232  ;;  %s1616_s15 = sadd.s32 4294967294, %s1176_s10  }
 0x412   : > { %s640_s23 = sand.u32 1, %s1616_s15  }
 0x413   : > { %s641_s19 = scalar_lea.sflag [#allocation10], %s640_s23 }
 0x414   : > { %1151 = dma.done.wait (!%p865_p9), %s641_s19, 128  }
 0x415   : > { %1153 = vsyncadd (!%p865_p9), %s641_s19, 4294967168  ;;  %s29_s10 = sadd.s32 1, %s1176_s10   ;;  %s1617_s27 = smov %s1160_s28 }
 0x416   : > { %p26_p2 = scmp.ge.s32.totalorder %s29_s10, 4   ;;  %s1618_s28 = smov %s1164_s29 }
 0x417   : > { %s1619_s29 = smov %s1376_s26  ;;  %s1620_s30 = smov %s1172_s9 }
 0x418   : > { %s1621_s9 = smov %s1623_s21  ;;  %28 = sbr.rel (!%p26_p2) target bundleno = 9 (0x9), region = 129 }
 0x41f   :  { %655 = vsyncpa [#allocation3], 1 }
 0x420   :  { %657 = vsyncpa [#allocation3 + $0x1], 1 }
 0x421   :  { %658 = vsyncpa [#allocation6], 1 }
 0x422   :  { %659 = vsyncpa [#allocation4], 1 }
 0x423   :  { %661 = vsyncpa [#allocation4 + $0x1], 1 }
 0x424   :  { %662 = vsyncpa [#allocation10], 1 }
 0x425   :  { %664 = vsyncpa [#allocation10 + $0x1], 1 }

</bundles_post_ra>
